<compile_context>
chip_gen: v7x
topology: tpu7x:2x2x1
jax: 0.10.0
libtpu: 0.0.40
codegen_flags: <defaults>
</compile_context>

<pallas_src>
import functools

import jax
import jax.numpy as jnp
from jax.experimental import pallas as pl
from jax.experimental.pallas import tpu as pltpu


_INV_SQRT2 = 0.7071067811865476


def _round_up(x, m):
    return ((x + m - 1) // m) * m


def _gelu_erf_f32(h):
    # Exact erf-GELU (PyTorch nn.GELU default), computed in f32.
    # TODO(synk): jax.nn.gelu(approximate=True) would move the transcendental
    # to the EUP slot on v6e/v7x, but changes numerics vs. the torch module.
    return 0.5 * h * (1.0 + jax.lax.erf(h * jnp.float32(_INV_SQRT2)))


def _vmem_budget_bytes():
    """~85% of this chip's per-core VMEM (fallback: 64 MiB, v7x-safe)."""
    cap = 64 * 1024 * 1024
    try:
        info_fn = getattr(pltpu, "get_tpu_info", None)
        if info_fn is not None:
            cap = int(getattr(info_fn(), "vmem_capacity_bytes", cap)) or cap
    except Exception:
        pass
    return int(0.85 * cap)


# --------------- Variant A: resident (single-buffered) weights --------------
def _make_resident_kernel(hp, h_chunk):
    """Row-tiled kernel; weights live untiled (one copy) in VMEM.

    The hidden dim is processed in `h_chunk`-wide slabs (static unrolled loop)
    so only a (tm, h_chunk) f32 slab is live and GELU work overlaps MXU work.
    """
    bounds = []
    lo = 0
    while lo < hp:
        hi = min(lo + h_chunk, hp)
        bounds.append((lo, hi))
        lo = hi

    def kernel(x_ref, w1_ref, b1_ref, w2_ref, b2_ref, o_ref):
        x = x_ref[...]
        acc = jnp.zeros((x.shape[0], o_ref.shape[-1]), jnp.float32)
        for (lo_, hi_) in bounds:
            # fc1 slab: native-dtype operands on the MXU, f32 accumulation.
            h = jnp.dot(x, w1_ref[:, lo_:hi_],
                        preferred_element_type=jnp.float32)
            h = h + b1_ref[:, lo_:hi_].astype(jnp.float32)
            h = _gelu_erf_f32(h)
            # Dropout with p=0.0 is the identity (module default drop=0.0).
            # TODO(synk): non-zero dropout would need pltpu.prng_* masking.
            acc = acc + jnp.dot(h.astype(w2_ref.dtype), w2_ref[lo_:hi_, :],
                                preferred_element_type=jnp.float32)
        acc = acc + b2_ref[...].astype(jnp.float32)
        o_ref[...] = acc.astype(o_ref.dtype)

    return kernel


# -------- Variant B: streamed weights, H-split reduction grid axis ----------
def _hsplit_kernel(x_ref, w1_ref, b1_ref, w2_ref, b2_ref, o_ref, acc_ref):
    k = pl.program_id(1)

    @pl.when(k == 0)
    def _():
        acc_ref[...] = jnp.zeros_like(acc_ref)

    h = jnp.dot(x_ref[...], w1_ref[...], preferred_element_type=jnp.float32)
    h = h + b1_ref[...].astype(jnp.float32)
    h = _gelu_erf_f32(h)
    # Dropout(p=0.0) is the identity.
    acc_ref[...] += jnp.dot(h.astype(w2_ref.dtype), w2_ref[...],
                            preferred_element_type=jnp.float32)

    @pl.when(k == pl.num_programs(1) - 1)
    def _():
        o_ref[...] = (acc_ref[...]
                      + b2_ref[...].astype(jnp.float32)).astype(o_ref.dtype)


@functools.partial(jax.jit, static_argnames=("block_m", "force_hsplit"))
def mlp_forward(x, w1, b1, w2, b2, *, block_m=512, force_hsplit=False):
    """x: (B, N, C); w1: (C, H); b1: (H,); w2: (H, O); b2: (O,)."""
    B, N, C = x.shape
    H = w1.shape[1]
    O = w2.shape[1]
    M = B * N

    x_item = jnp.dtype(x.dtype).itemsize
    w_item = jnp.dtype(w1.dtype).itemsize

    # Lane-dense padding of hidden/output feature dims only when misaligned.
    # Exact: padded hidden units have zero weight/bias, GELU(0)=0, and padded
    # output columns are sliced off.  C (the contraction dim) is never padded:
    # the x / w1 blocks cover the full dim, so no wrapper-side copy of x.
    Hp = _round_up(H, 128)
    Op = _round_up(O, 128)

    budget = _vmem_budget_bytes()

    # ------------- tile / variant selection (trace-time Python) -------------
    C8 = _round_up(C, 8)      # sublane rounding of the contraction dim in VMEM
    Cl = _round_up(C, 128)    # lane rounding of the x tile in VMEM
    h_chunk = min(Hp, 512)
    resident_w = (C8 * Hp + Hp * Op + 8 * (Hp + Op)) * w_item  # single copy

    def fits_resident(tm_):
        need = (resident_w
                + 2 * tm_ * Cl * x_item      # double-buffered x tiles
                + 2 * tm_ * Op * x_item      # double-buffered out tiles
                + tm_ * h_chunk * 4          # live f32 GELU slab
                + tm_ * Op * 4)              # f32 accumulator
        return int(1.15 * need) <= budget

    tm_cap = max(8, min(block_m, _round_up(M, 8)))

    tm = None
    if not force_hsplit:
        t = tm_cap
        while True:
            if fits_resident(t):
                tm = t
                break
            if t <= 8:
                break
            t = max(8, _round_up(t // 2, 8))
    use_hsplit = force_hsplit or tm is None

    th = None
    if use_hsplit:
        tm = None
        th_candidates = [c for c in (512, 256, 128) if Hp % c == 0]

        def fits_hsplit(tm_, th_):
            need = (2 * (C8 * th_ + th_ * Op + 8 * th_) * w_item  # streamed w tiles
                    + 8 * Op * w_item                             # b2 resident
                    + 2 * tm_ * Cl * x_item + 2 * tm_ * Op * x_item
                    + tm_ * Op * 4                                # acc scratch
                    + tm_ * th_ * 4)                              # live f32 slab
            return int(1.15 * need) <= budget

        t = tm_cap
        while tm is None:
            for c in th_candidates:
                if fits_hsplit(t, c):
                    tm, th = t, c
                    break
            if tm is None:
                if t <= 8:
                    tm, th = 8, th_candidates[-1]   # last resort
                    break
                t = max(8, _round_up(t // 2, 8))

    # Row padding to a tile multiple; make the tile count even so v7x megacore
    # (2 TCs sharing the "parallel" M axis) gets balanced work.
    Mp = _round_up(M, tm)
    n_tiles = Mp // tm
    if n_tiles > 1 and n_tiles % 2 == 1:
        Mp += tm

    x2d = x.reshape(M, C)
    if Mp != M:
        x2d = jnp.pad(x2d, ((0, Mp - M), (0, 0)))

    w1p = w1 if Hp == H else jnp.pad(w1, ((0, 0), (0, Hp - H)))
    b1p = (b1 if Hp == H else jnp.pad(b1, (0, Hp - H))).reshape(1, Hp)
    w2p = w2 if (Hp == H and Op == O) else jnp.pad(w2, ((0, Hp - H), (0, Op - O)))
    b2p = (b2 if Op == O else jnp.pad(b2, (0, Op - O))).reshape(1, Op)

    cost = pl.CostEstimate(
        flops=2 * M * (C * H + H * O),
        transcendentals=M * H,
        bytes_accessed=((M * C + M * O) * x_item
                        + (C * H + H * O + H + O) * w_item),
    )
    compiler_params = lambda sems: pltpu.CompilerParams(
        dimension_semantics=sems, vmem_limit_bytes=int(budget))

    if not use_hsplit:
        out2d = pl.pallas_call(
            _make_resident_kernel(Hp, h_chunk),
            out_shape=jax.ShapeDtypeStruct((Mp, Op), x.dtype),
            grid_spec=pltpu.PrefetchScalarGridSpec(
                num_scalar_prefetch=0,
                grid=(Mp // tm,),
                in_specs=[
                    pl.BlockSpec((tm, C), lambda i: (i, 0)),             # x tile
                    pl.BlockSpec(memory_space=pltpu.MemorySpace.VMEM),   # w1 resident (1 copy)
                    pl.BlockSpec(memory_space=pltpu.MemorySpace.VMEM),   # b1
                    pl.BlockSpec(memory_space=pltpu.MemorySpace.VMEM),   # w2 resident (1 copy)
                    pl.BlockSpec(memory_space=pltpu.MemorySpace.VMEM),   # b2
                ],
                out_specs=pl.BlockSpec((tm, Op), lambda i: (i, 0)),
            ),
            compiler_params=compiler_params(("parallel",)),
            cost_estimate=cost,
        )(x2d, w1p, b1p, w2p, b2p)
    else:
        out2d = pl.pallas_call(
            _hsplit_kernel,
            out_shape=jax.ShapeDtypeStruct((Mp, Op), x.dtype),
            grid_spec=pltpu.PrefetchScalarGridSpec(
                num_scalar_prefetch=0,
                grid=(Mp // tm, Hp // th),
                in_specs=[
                    pl.BlockSpec((tm, C), lambda i, k: (i, 0)),          # x tile
                    pl.BlockSpec((C, th), lambda i, k: (0, k)),          # w1 slab (streamed)
                    pl.BlockSpec((1, th), lambda i, k: (0, k)),          # b1 slab
                    pl.BlockSpec((th, Op), lambda i, k: (k, 0)),         # w2 slab (streamed)
                    pl.BlockSpec(memory_space=pltpu.MemorySpace.VMEM),   # b2 resident
                ],
                out_specs=pl.BlockSpec((tm, Op), lambda i, k: (i, 0)),
                scratch_shapes=[pltpu.VMEM((tm, Op), jnp.float32)],
            ),
            compiler_params=compiler_params(("parallel", "arbitrary")),
            cost_estimate=cost,
        )(x2d, w1p, b1p, w2p, b2p)

    if Mp != M or Op != O:
        out2d = out2d[:M, :O]
    return out2d.reshape(B, N, O)


def mlp_reference(x, w1, b1, w2, b2):
    h = jnp.einsum("bnc,ch->bnh", x, w1) + b1
    h = 0.5 * h * (1.0 + jax.lax.erf(h * _INV_SQRT2))
    return jnp.einsum("bnh,ho->bno", h, w2) + b2


if __name__ == "__main__":
    # Small shapes consistent with the module: tokens (B, N, C).
    B, N = 2, 8
    in_features = 32
    hidden_features = 64
    out_features = 32   # out_features defaults to in_features

    key = jax.random.PRNGKey(0)
    kx, k1, k2, k3, k4 = jax.random.split(key, 5)

    x = jax.random.normal(kx, (B, N, in_features), dtype=jnp.float32)
    # nn.Linear fc1.weight has shape (H, C); stored here as (C, H) = weight.T
    w1 = jax.random.normal(k1, (in_features, hidden_features), jnp.float32) * 0.05
    b1 = jax.random.normal(k2, (hidden_features,), jnp.float32) * 0.05
    w2 = jax.random.normal(k3, (hidden_features, out_features), jnp.float32) * 0.05
    b2 = jax.random.normal(k4, (out_features,), jnp.float32) * 0.05

    ref = mlp_reference(x, w1, b1, w2, b2)

    # Fast path: resident single-buffered weights.
    out = jax.block_until_ready(mlp_forward(x, w1, b1, w2, b2))
    assert out.shape == (B, N, out_features)
    assert jnp.allclose(out, ref, atol=1e-4, rtol=1e-4), "mismatch (resident path)"

    # Exercise the streaming H-split fallback (used automatically when the
    # resident weights would not fit the chip's VMEM budget, e.g. big H on v7x).
    out_hs = jax.block_until_ready(mlp_forward(x, w1, b1, w2, b2, force_hsplit=True))
    assert jnp.allclose(out_hs, ref, atol=1e-4, rtol=1e-4), "mismatch (hsplit path)"

    print("KERNEL_OK")
</pallas_src>

<mosaic_0001>
module attributes {stable_mosaic.version = 11 : i64} {
  func.func @kernel(%arg0: i32, %arg1: memref<16x32xf32, #tpu.memory_space<vmem>>, %arg2: memref<32x128xf32, #tpu.memory_space<vmem>>, %arg3: memref<1x128xf32, #tpu.memory_space<vmem>>, %arg4: memref<128x128xf32, #tpu.memory_space<vmem>>, %arg5: memref<1x128xf32, #tpu.memory_space<vmem>>, %arg6: memref<16x128xf32, #tpu.memory_space<vmem>>) attributes {dimension_semantics = [#tpu.dimension_semantics<parallel>], iteration_bounds = array<i64: 1>, scalar_prefetch = 0 : i64, scratch_operands = 0 : i64, tpu.core_type = #tpu.core_type<tc>, window_params = [{transform_indices = @transform_0, window_bounds = array<i64: 16, 32>}, {pipeline_mode = #tpu.pipeline_mode<synchronous>, transform_indices = @transform_1, window_bounds = array<i64: 32, 128>}, {pipeline_mode = #tpu.pipeline_mode<synchronous>, transform_indices = @transform_2, window_bounds = array<i64: 1, 128>}, {pipeline_mode = #tpu.pipeline_mode<synchronous>, transform_indices = @transform_3, window_bounds = array<i64: 128, 128>}, {pipeline_mode = #tpu.pipeline_mode<synchronous>, transform_indices = @transform_4, window_bounds = array<i64: 1, 128>}, {transform_indices = @transform_5, window_bounds = array<i64: 16, 128>}]} {
    %c0 = arith.constant 0 : index
    %c0_0 = arith.constant 0 : index
    %0 = vector.load %arg1[%c0, %c0_0] : memref<16x32xf32, #tpu.memory_space<vmem>>, vector<16x32xf32>
    %cst = arith.constant 0.000000e+00 : f32
    %1 = vector.broadcast %cst : f32 to vector<16x128xf32>
    %c0_1 = arith.constant 0 : index
    %c0_2 = arith.constant 0 : index
    %2 = vector.load %arg2[%c0_1, %c0_2] : memref<32x128xf32, #tpu.memory_space<vmem>>, vector<32x128xf32>
    %cst_3 = arith.constant dense<0.000000e+00> : vector<16x128xf32>
    %3 = tpu.matmul %0, %2, %cst_3 {dimension_numbers = #tpu.dot_dimension_numbers<[1], [0], [0], [1], [0, 0, 1, 1], [], []>} : vector<16x32xf32>, vector<32x128xf32>, vector<16x128xf32> -> vector<16x128xf32>
    %c0_4 = arith.constant 0 : index
    %c0_5 = arith.constant 0 : index
    %4 = vector.load %arg3[%c0_4, %c0_5] : memref<1x128xf32, #tpu.memory_space<vmem>>, vector<1x128xf32>
    %5 = vector.broadcast %4 : vector<1x128xf32> to vector<16x128xf32>
    %6 = arith.addf %3, %5 : vector<16x128xf32>
    %cst_6 = arith.constant 5.000000e-01 : f32
    %7 = vector.broadcast %cst_6 : f32 to vector<16x128xf32>
    %8 = arith.mulf %7, %6 : vector<16x128xf32>
    %cst_7 = arith.constant 0.707106769 : f32
    %9 = vector.broadcast %cst_7 : f32 to vector<16x128xf32>
    %10 = arith.mulf %6, %9 : vector<16x128xf32>
    %11 = math.erf %10 : vector<16x128xf32>
    %cst_8 = arith.constant 1.000000e+00 : f32
    %12 = vector.broadcast %cst_8 : f32 to vector<16x128xf32>
    %13 = arith.addf %12, %11 : vector<16x128xf32>
    %14 = arith.mulf %8, %13 : vector<16x128xf32>
    %c0_9 = arith.constant 0 : index
    %c0_10 = arith.constant 0 : index
    %15 = vector.load %arg4[%c0_9, %c0_10] : memref<128x128xf32, #tpu.memory_space<vmem>>, vector<128x128xf32>
    %cst_11 = arith.constant dense<0.000000e+00> : vector<16x128xf32>
    %16 = tpu.matmul %14, %15, %cst_11 {dimension_numbers = #tpu.dot_dimension_numbers<[1], [0], [0], [1], [0, 0, 1, 1], [], []>} : vector<16x128xf32>, vector<128x128xf32>, vector<16x128xf32> -> vector<16x128xf32>
    %17 = arith.addf %1, %16 : vector<16x128xf32>
    %c0_12 = arith.constant 0 : index
    %c0_13 = arith.constant 0 : index
    %18 = vector.load %arg5[%c0_12, %c0_13] : memref<1x128xf32, #tpu.memory_space<vmem>>, vector<1x128xf32>
    %19 = vector.broadcast %18 : vector<1x128xf32> to vector<16x128xf32>
    %20 = arith.addf %17, %19 : vector<16x128xf32>
    %c0_14 = arith.constant 0 : index
    %c0_15 = arith.constant 0 : index
    %21 = vector.load %arg6[%c0_14, %c0_15] : memref<16x128xf32, #tpu.memory_space<vmem>>, vector<16x128xf32>
    tpu.vector_store %arg6[%c0_14, %c0_15], %20 {strides = array<i32>} : memref<16x128xf32, #tpu.memory_space<vmem>>, vector<16x128xf32>,
    return
  }
  func.func @transform_0(%arg0: i32) -> (i32, i32) {
    %c0_i32 = arith.constant 0 : i32
    %c0_i32_0 = arith.constant 0 : i32
    return %arg0, %c0_i32 : i32, i32
  }
  func.func @transform_1(%arg0: i32) -> (i32, i32) {
    %c0_i32 = arith.constant 0 : i32
    %c0_i32_0 = arith.constant 0 : i32
    %c0_i32_1 = arith.constant 0 : i32
    return %c0_i32, %c0_i32_0 : i32, i32
  }
  func.func @transform_2(%arg0: i32) -> (i32, i32) {
    %c0_i32 = arith.constant 0 : i32
    %c0_i32_0 = arith.constant 0 : i32
    %c0_i32_1 = arith.constant 0 : i32
    return %c0_i32, %c0_i32_0 : i32, i32
  }
  func.func @transform_3(%arg0: i32) -> (i32, i32) {
    %c0_i32 = arith.constant 0 : i32
    %c0_i32_0 = arith.constant 0 : i32
    %c0_i32_1 = arith.constant 0 : i32
    return %c0_i32, %c0_i32_0 : i32, i32
  }
  func.func @transform_4(%arg0: i32) -> (i32, i32) {
    %c0_i32 = arith.constant 0 : i32
    %c0_i32_0 = arith.constant 0 : i32
    %c0_i32_1 = arith.constant 0 : i32
    return %c0_i32, %c0_i32_0 : i32, i32
  }
  func.func @transform_5(%arg0: i32) -> (i32, i32) {
    %c0_i32 = arith.constant 0 : i32
    %c0_i32_0 = arith.constant 0 : i32
    return %arg0, %c0_i32 : i32, i32
  }
}

</mosaic_0001>

<bundles_post_ra>
// kernel: mlp_forward.1
= control target key start
LH: loop header
LB: loop body
LE: loop exit
PB: predicated region body
PF: predicated region fallthrough
CT: control target
= control target key end

     0   :  { %vm33_vm0 = vcmask 261120   ;;  %s457_s1 = inlined_call_operand.vmem [shape: f32[32,128], index: 1, kind: input, shape index: {}]   ;;  %s458_s0 = inlined_call_operand.vmem [shape: f32[16,32], index: 0, kind: input, shape index: {}]   ;;  %s459_s3 = inlined_call_operand.vmem [shape: f32[128,128], index: 3, kind: input, shape index: {}]   ;;  %s460_s2 = inlined_call_operand.vmem [shape: f32[1,128], index: 2, kind: input, shape index: {}]   ;;  %s461_s4 = inlined_call_operand.vmem [shape: f32[1,128], index: 4, kind: input, shape index: {}]   ;;  %s462_s5 = inlined_call_operand.vmem [shape: f32[16,128], index: 5, kind: output, shape index: {}]  }
   0x1   :  { %v22_v0 = vld [vmem:[%s457_s1] sm:$0xff]  ;;  %v23_v1 = vld [vmem:[%s457_s1 + $0x8] sm:$0xff]  ;;  %v24_v2 = vld [vmem:[%s457_s1 + $0x10] sm:$0xff] }
   0x2   :  { %v303_v3 = vpack.c.bf16 %v23_v1, %v22_v0  ;;  %v25_v4 = vld [vmem:[%s457_s1 + $0x18] sm:$0xff]  ;;  %v20_v5 = vld [vmem:[%s458_s0] sm:$0xff]  ;;  %v126_v8 = vld [vmem:[%s459_s3 + $0x8] sm:$0xff] }
   0x3   :  { %v307_v6 = vpack.c.bf16 %v25_v4, %v24_v2  ;;  %265 = vmatprep.mubr.msk.f32.mxu0 %vm33_vm0, %v20_v5  ;;  %v125_v7 = vld [vmem:[%s459_s3] sm:$0xff]  ;;  %v127_v9 = vld [vmem:[%s459_s3 + $0x10] sm:$0xff]  ;;  %v128_v11 = vld [vmem:[%s459_s3 + $0x18] sm:$0xff] }
   0x4   :  { %304 = vmatprep.subr.bf16.mxu0 %v303_v3  ;;  %v311_v10 = vpack.c.bf16 %v126_v8, %v125_v7  ;;  %v315_v12 = vpack.c.bf16 %v128_v11, %v127_v9  ;;  %v129_v13 = vld [vmem:[%s459_s3 + $0x20] sm:$0xff]  ;;  %v130_v14 = vld [vmem:[%s459_s3 + $0x28] sm:$0xff]  ;;  %v131_v17 = vld [vmem:[%s459_s3 + $0x30] sm:$0xff] }
   0x5   :  { %306 = vmatpush3.bf16.msra.mxu0 %v303_v3  ;;  %v319_v15 = vpack.c.bf16 %v130_v14, %v129_v13  ;;  %v21_v16 = vld [vmem:[%s458_s0 + $0x8] sm:$0xff]  ;;  %v132_v18 = vld [vmem:[%s459_s3 + $0x38] sm:$0xff]  ;;  %v133_v20 = vld [vmem:[%s459_s3 + $0x40] sm:$0xff] }
   0x6   :  { %308 = vmatprep.subr.bf16.mxu0 %v307_v6  ;;  %312 = vmatprep.subr.bf16.mxu1 %v311_v10  ;;  %v323_v19 = vpack.c.bf16 %v132_v18, %v131_v17  ;;  %v134_v21 = vld [vmem:[%s459_s3 + $0x48] sm:$0xff]  ;;  %v135_v23 = vld [vmem:[%s459_s3 + $0x50] sm:$0xff]  ;;  %v136_v24 = vld [vmem:[%s459_s3 + $0x58] sm:$0xff] }
   0x7   :  { %314 = vmatpush3.bf16.msra.mxu1 %v311_v10  ;;  %v327_v22 = vpack.c.bf16 %v134_v21, %v133_v20  ;;  %v331_v25 = vpack.c.bf16 %v136_v24, %v135_v23  ;;  %v137_v26 = vld [vmem:[%s459_s3 + $0x60] sm:$0xff]  ;;  %v138_v27 = vld [vmem:[%s459_s3 + $0x68] sm:$0xff]  ;;  %v139_v29 = vld [vmem:[%s459_s3 + $0x70] sm:$0xff] }
   0x8   :  { %316 = vmatprep.subr.bf16.mxu1 %v315_v12  ;;  %v335_v28 = vpack.c.bf16 %v138_v27, %v137_v26  ;;  %v140_v30 = vld [vmem:[%s459_s3 + $0x78] sm:$0xff]  ;;  %v229_v32 = vld [vmem:[%s460_s2] ss:$0 sm:$0xff] }
   0x9   :  { %310 = vmatpush3.bf16.msra.mxu0 %v307_v6  ;;  %v339_v31 = vpack.c.bf16 %v140_v30, %v139_v29  ;;  %v232_v47 = vld [vmem:[%s461_s4] ss:$0 sm:$0xff] }
   0xb   :  { %318 = vmatpush3.bf16.msra.mxu1 %v315_v12 }
   0xc   :  { %266 = vmatmul.mubr.msk.f32.vlgmr.msra.gmra.mrb[0].mxu0 %vm33_vm0, %v21_v16  ;;  %320 = vmatprep.subr.bf16.mxu1 %v319_v15 }
   0xf   :  { %322 = vmatpush3.bf16.msra.mxu1 %v319_v15 }
  0x10   :  { %324 = vmatprep.subr.bf16.mxu1 %v323_v19 }
  0x13   :  { %326 = vmatpush3.bf16.msra.mxu1 %v323_v19 }
  0x14   :  { %328 = vmatprep.subr.bf16.mxu1 %v327_v22 }
  0x17   :  { %330 = vmatpush3.bf16.msra.mxu1 %v327_v22 }
  0x18   :  { %332 = vmatprep.subr.bf16.mxu1 %v331_v25 }
  0x1b   :  { %334 = vmatpush3.bf16.msra.mxu1 %v331_v25 }
  0x1c   :  { %336 = vmatprep.subr.bf16.mxu1 %v335_v28 }
  0x1f   :  { %338 = vmatpush3.bf16.msra.mxu1 %v335_v28 }
  0x20   :  { %340 = vmatprep.subr.bf16.mxu1 %v339_v31 }
  0x23   :  { %342 = vmatpush3.bf16.msra.mxu1 %v339_v31 }
  0xdf   :  { %v267_v33 = vpop.f32.mrb[0].mxu0 }
  0xe0   :  { %v112_v34 = vadd.f32 %v267_v33, %v229_v32  ;;  %v106_v35 = vpop.f32.mrb[1].mxu0 }
  0xe1   :  { %v107_v36 = vadd.f32 %v229_v32, %v106_v35 }
  0xe2   :  { %v118_v37 = vmul.f32 0.70710677, %v112_v34  ;;  %v116_v44 = vmul.f32 0.5, %v112_v34 }
  0xe3   :  { %v117_v38 = vmul.f32 0.70710677, %v107_v36  ;;  %v115_v42 = vmul.f32 0.5, %v107_v36 }
  0xe4   :  { %343 = verf.f32 %v118_v37 }
  0xe5   :  { %345 = verf.f32 %v117_v38 }
  0xee   :  { %v344_v39 = vpop.eup %343 }
  0xef   :  { %v346_v40 = vpop.eup %345  ;;  %v122_v41 = vadd.f32 1.0, %v344_v39 }
  0xf0   :  { %v121_v43 = vadd.f32 1.0, %v346_v40 }
  0xf1   :  { %v124_v46 = vmul.f32 %v122_v41, %v116_v44 }
  0xf2   :  { %v123_v45 = vmul.f32 %v121_v43, %v115_v42 }
  0xf4   :  { %300 = vmatprep.mubr.f32.mxu1 %v123_v45 }
  0xf5   :  { %301 = vmatmul.mubr.f32.vlgmr.msra.gmra.mrb[0].mxu1 %v124_v46 }
 0x1c8   :  { %v302_v48 = vpop.f32.mrb[0].mxu1 }
 0x1c9   :  { %v220_v49 = vadd.f32 %v302_v48, %v232_v47  ;;  %v214_v50 = vpop.f32.mrb[1].mxu1 }
 0x1ca   :  { %v215_v51 = vadd.f32 %v232_v47, %v214_v50 }
 0x1cb   :  { %224 = vst [vmem:[%s462_s5 + $0x8] sm:$0xff] %v220_v49 }
 0x1cc   :  { %223 = vst [vmem:[%s462_s5] sm:$0xff] %v215_v51 }

</bundles_post_ra>
